<compile_context>
chip_gen: v7x
topology: tpu7x:2x2x1
jax: 0.10.0
libtpu: 0.0.40
codegen_flags: <defaults>
</compile_context>

<pallas_src>
import functools
import itertools as it

import jax
import jax.numpy as jnp
import numpy as np
from jax.experimental import pallas as pl
from jax.experimental.pallas import tpu as pltpu

# ---- deterministic "tokenizer" / module constants (baked at trace time) ----
BLANK = 0          # module __init__ default
PAD_ID = 0         # tokenizer.pad_token_id
UNK_ID = 3         # tokenizer.unk_token_id
VOCAB_SIZE = 6     # len(tokenizer)  (< num_labels, so the unk clamp is exercised)

_LANES = 128


def _round_up(x, m):
    return (x + m - 1) // m * m


def _pick_block_batch(batch, row_bytes, budget=8 << 20):
    """Pick rows-per-grid-step BB: a divisor of `batch` (so the wrapper reshape
    is a free leading-dim split, no HBM pad), <= 8 (sublane fill), within a
    per-block byte budget, preferring >= 2 grid steps so ("parallel",) can
    shard across v7x's two TensorCores."""
    divs = [d for d in range(1, min(8, batch) + 1) if batch % d == 0]
    fits = [d for d in divs if d * row_bytes <= budget] or [1]
    for d in sorted(fits, reverse=True):
        if batch // d >= 2:
            return d
    return max(fits)          # batch == 1 (or nothing splittable)


def _inclusive_scan_lanes(x):
    """Inclusive prefix sum of an i32 (BB, Tp) array along the lane axis
    (Tp a multiple of 128).  For Tp > 128 use a two-level scan: Hillis-Steele
    inside each 128-lane vreg (7 rolls) plus a tiny cross-block offset add,
    which keeps XLU work ~constant per 128 lanes (full-width rolls cross vreg
    boundaries)."""
    i32 = jnp.int32
    bb, tp = x.shape

    if tp <= _LANES:
        lane = jax.lax.broadcasted_iota(i32, (bb, tp), 1)
        cum = x
        sh = 1
        while sh < tp:
            # mask the circular wrap of the roll before adding
            cum = cum + jnp.where(lane >= sh, pltpu.roll(cum, shift=sh, axis=1), 0)
            sh *= 2
        return cum

    nblk = tp // _LANES
    x3 = x.reshape(bb, nblk, _LANES)
    lane = jax.lax.broadcasted_iota(i32, (bb, nblk, _LANES), 2)
    cum = x3
    sh = 1
    while sh < _LANES:
        cum = cum + jnp.where(lane >= sh, pltpu.roll(cum, shift=sh, axis=2), 0)
        sh *= 2
    blk_tot = cum[:, :, _LANES - 1:_LANES]                      # (bb, nblk, 1)
    # exclusive scan of the (small, static) per-block totals
    pieces = [jnp.zeros((bb, 1, 1), i32)]
    run = jnp.zeros((bb, 1, 1), i32)
    for k in range(1, nblk):
        run = run + blk_tot[:, k - 1:k, :]
        pieces.append(run)
    off = jnp.concatenate(pieces, axis=1)                       # (bb, nblk, 1)
    return (cum + off).reshape(bb, tp)


def _ctc_kernel(em_ref, tok_ref, len_ref, *, num_labels, blank, pad_id, unk_id,
                vocab_size):
    i32 = jnp.int32
    e = em_ref[0]                               # (BB, T, L): time on sublanes, labels on lanes
    BB, T, L = e.shape
    Tp = tok_ref.shape[-1]                      # lane-aligned output width (multiple of 128)

    # ---------- argmax over labels (lane reduction; first max on ties) -------
    row_max = jnp.max(e, axis=-1, keepdims=True)                       # (BB, T, 1)
    lab = jax.lax.broadcasted_iota(i32, (1, 1, L), 2)                  # broadcast in the where
    idx = jnp.min(jnp.where(e == row_max, lab, num_labels), axis=-1)   # (BB, T) i32

    # Pad time up to the lane-aligned width ON-CHIP (pad value == blank so the
    # padded steps are dropped by the CTC collapse); no HBM pad in the wrapper.
    if Tp > T:
        idx = jnp.concatenate(
            [idx, jnp.full((BB, Tp - T), blank, i32)], axis=1)         # (BB, Tp)

    lane = jax.lax.broadcasted_iota(i32, (BB, Tp), 1)                  # time / slot index

    # ---------- CTC collapse mask: not blank, differs from predecessor -------
    prev = pltpu.roll(idx, shift=1, axis=1)     # prev[t] = idx[t-1]; circular wrap masked below
    keep = (idx != blank) & ((lane == 0) | (idx != prev))
    keep_i = keep.astype(i32)

    # ---------- destination slot: inclusive prefix sum over lanes ------------
    cum = _inclusive_scan_lanes(keep_i)                                # (BB, Tp)
    pos = cum - 1
    n_kept = jnp.sum(keep_i, axis=1, keepdims=True)                    # (BB, 1)

    # ---------- left-compaction: time-tiled one-hot gather on the MXU --------
    # vals[b, j] = sum_t idx[b, t] * [kept(t) and slot(t) == j]  (single nonzero term).
    # bf16 operands are exact for label ids <= 256 (guarded) and run at native
    # MXU rate on v6e/v7x; accumulate in f32.  Only a (BB, Tp, 128) scatter
    # chunk is ever live -- never the full (BB, Tp, Tp) matrix.
    mm_dtype = jnp.bfloat16 if num_labels <= 256 else jnp.float32
    posk = jnp.where(keep, pos, -1)                                    # -1 never matches a slot
    idx_mm = idx.astype(mm_dtype)
    jj = jax.lax.broadcasted_iota(i32, (1, Tp, _LANES), 1)             # output slot ids

    def compact_chunk(posk_c, idx_c, acc):
        pb = jax.lax.broadcast_in_dim(posk_c, (BB, Tp, _LANES), (0, 2))
        scat = (pb == jj).astype(mm_dtype)                             # (BB, Tp, 128)
        idx_rep = jax.lax.broadcast_in_dim(idx_c, (BB, 8, _LANES), (0, 2))
        part = jnp.einsum("bqt,bjt->bqj", idx_rep, scat,
                          preferred_element_type=jnp.float32)          # (BB, 8, Tp)
        return acc + part

    n_chunks = Tp // _LANES
    acc0 = jnp.zeros((BB, 8, Tp), jnp.float32)
    if n_chunks == 1:
        acc3 = compact_chunk(posk, idx_mm, acc0)
    else:
        def body(c, acc):
            t0 = pl.multiple_of(c * _LANES, _LANES)
            posk_c = jax.lax.dynamic_slice(posk, (0, t0), (BB, _LANES))
            idx_c = jax.lax.dynamic_slice(idx_mm, (0, t0), (BB, _LANES))
            return compact_chunk(posk_c, idx_c, acc)
        acc3 = jax.lax.fori_loop(0, n_chunks, body, acc0)
    vals = acc3[:, 0, :]                        # replicated rows are identical -> take row 0

    # vals are exact non-negative small integers (single nonzero f32 term per
    # output), so +0.5 followed by truncation == round-to-nearest.
    vals_i = (vals + 0.5).astype(i32)

    hit = lane < n_kept                                                # slot j populated?
    out = jnp.where(hit, vals_i, pad_id)                               # pad_sequence padding_value
    out = jnp.where(out >= vocab_size, unk_id, out)                    # unk clamp

    tok_ref[0] = out                                                   # (BB, Tp) lane-dense store
    len_ref[0] = n_kept                                                # (BB, 1)


@functools.partial(jax.jit, static_argnames=("blank", "pad_id", "unk_id", "vocab_size"))
def greedy_ctc_decode(emission, blank=BLANK, pad_id=PAD_ID, unk_id=UNK_ID,
                      vocab_size=VOCAB_SIZE):
    """emission: [B, T, L] logits -> (tokens [B, Tp] int32 padded with pad_id,
    lengths [B] int32).  Tokens are full width (Tp = T rounded up to 128); the
    caller trims to lengths.max() to reproduce pad_sequence's dynamic width."""
    B, T, L = emission.shape
    Tp = _round_up(max(T, 1), _LANES)
    BB = _pick_block_batch(B, emission.dtype.itemsize * T * L)
    nb = B // BB

    # Free leading-dim split (no transpose / pad -> no extra HBM traffic).
    em = emission.reshape(nb, BB, T, L)

    kernel = functools.partial(
        _ctc_kernel, num_labels=L, blank=blank, pad_id=pad_id, unk_id=unk_id,
        vocab_size=vocab_size)

    # Per-step VMEM need: double-buffered logits block + argmax temps + one
    # 128-wide compaction chunk + row-width temps.  Explicit limit keeps the
    # kernel inside v5e's 16 MiB scoped default and v7x's 64 MiB physical VMEM.
    mm_bytes = 2 if L <= 256 else 4
    est = (2 * 4 * BB * T * L                       # double-buffered logits block
           + 3 * 4 * BB * T * L                     # argmax temporaries
           + 3 * mm_bytes * BB * Tp * _LANES        # one-hot chunk + staging
           + 32 * 4 * BB * Tp)                      # row-width i32/f32 temps + accumulator
    vmem_limit = int(min(64 << 20, max(16 << 20, 2 * est)))

    # TODO(synk): tokenizer string decode (List[str]) is non-numeric, left out.
    # TODO(synk): very large label axes (BPE vocab ~1k-4k) should get their own
    #   'arbitrary' grid dimension carrying a running (max, argmax); very long
    #   T (>= ~4k) wants a carry-based tiled compaction instead of the one-hot.
    tok, lens = pl.pallas_call(
        kernel,
        out_shape=(
            jax.ShapeDtypeStruct((nb, BB, Tp), jnp.int32),
            jax.ShapeDtypeStruct((nb, BB, 1), jnp.int32),
        ),
        grid=(nb,),
        in_specs=[pl.BlockSpec((1, BB, T, L), lambda b: (b, 0, 0, 0))],
        out_specs=(
            pl.BlockSpec((1, BB, Tp), lambda b: (b, 0, 0)),
            pl.BlockSpec((1, BB, 1), lambda b: (b, 0, 0)),
        ),
        compiler_params=pltpu.CompilerParams(
            dimension_semantics=("parallel",),
            vmem_limit_bytes=vmem_limit),
    )(em)

    return tok.reshape(B, Tp), lens.reshape(B)


def _ref_decode(emission_np):
    """Pure-numpy reference mirroring the PyTorch module."""
    seqs = []
    for row in emission_np:
        idx = row.argmax(-1)
        collapsed = [k for k, _ in it.groupby(idx.tolist())]   # unique_consecutive
        collapsed = [c for c in collapsed if c != BLANK]        # drop blanks
        seqs.append(collapsed)
    max_len = max((len(s) for s in seqs), default=0)
    out = np.full((len(seqs), max_len), PAD_ID, dtype=np.int32)
    for i, s in enumerate(seqs):
        out[i, : len(s)] = s
    out[out >= VOCAB_SIZE] = UNK_ID
    return out


if __name__ == "__main__":
    B, T, L = 2, 16, 8          # batch, num_seq (time), num_label
    key = jax.random.PRNGKey(0)
    emission = jax.random.normal(key, (B, T, L), dtype=jnp.float32)

    tokens, lengths = greedy_ctc_decode(emission)
    tokens = jax.block_until_ready(tokens)
    lengths = jax.block_until_ready(lengths)

    em_np = np.asarray(emission)
    ref = _ref_decode(em_np)
    lens_np = np.asarray(lengths)
    full = np.asarray(tokens)

    # trim to the batch-wide max collapsed length (pad_sequence width) -- test glue
    max_len = int(lens_np.max()) if lens_np.size else 0
    got = full[:, :max_len]
    assert got.shape == ref.shape, (got.shape, ref.shape)
    assert np.array_equal(got, ref), (got, ref)

    # everything past each row's collapsed length is padding
    for i, ln in enumerate(lens_np):
        assert (full[i, ln:] == PAD_ID).all()

    ref_lens = np.array(
        [len([k for k, _ in it.groupby(r.argmax(-1).tolist()) if k != BLANK])
         for r in em_np], dtype=np.int32)
    assert np.array_equal(lens_np, ref_lens), (lens_np, ref_lens)
    print("KERNEL_OK")
</pallas_src>

<mosaic_0001>
module attributes {stable_mosaic.version = 11 : i64} {
  func.func @_ctc_kernel(%arg0: i32, %arg1: memref<1x1x16x8xf32, #tpu.memory_space<vmem>>, %arg2: memref<1x1x128xi32, #tpu.memory_space<vmem>>, %arg3: memref<1x1x1xi32, #tpu.memory_space<vmem>>) attributes {dimension_semantics = [#tpu.dimension_semantics<parallel>], iteration_bounds = array<i64: 2>, scalar_prefetch = 0 : i64, scratch_operands = 0 : i64, tpu.core_type = #tpu.core_type<tc>, window_params = [{transform_indices = @transform_0, window_bounds = array<i64: 1, 1, 16, 8>}, {transform_indices = @transform_1, window_bounds = array<i64: 1, 1, 128>}, {transform_indices = @transform_2, window_bounds = array<i64: 1, 1, 1>}]} {
    %c0 = arith.constant 0 : index
    %c0_0 = arith.constant 0 : index
    %c0_1 = arith.constant 0 : index
    %c0_2 = arith.constant 0 : index
    %0 = vector.load %arg1[%c0, %c0_0, %c0_1, %c0_2] : memref<1x1x16x8xf32, #tpu.memory_space<vmem>>, vector<1x1x16x8xf32>
    %1 = vector.shape_cast %0 : vector<1x1x16x8xf32> to vector<1x16x8xf32>
    %cst = arith.constant dense<0xFF800000> : vector<1x16xf32>
    %2 = vector.multi_reduction <maximumf>, %1, %cst [2] : vector<1x16x8xf32> to vector<1x16xf32>
    %3 = vector.shape_cast %2 : vector<1x16xf32> to vector<1x16x1xf32>
    %4 = tpu.iota {dimensions = array<i32: 2>} : vector<1x1x8xi32>
    %5 = vector.broadcast %3 : vector<1x16x1xf32> to vector<1x16x8xf32>
    %6 = arith.cmpf oeq, %1, %5 : vector<1x16x8xf32>
    %c8_i32 = arith.constant 8 : i32
    %7 = vector.shape_cast %4 : vector<1x1x8xi32> to vector<1x1x8xi32>
    %8 = vector.broadcast %7 : vector<1x1x8xi32> to vector<1x16x8xi32>
    %9 = vector.broadcast %c8_i32 : i32 to vector<1x16x8xi32>
    %10 = arith.select %6, %8, %9 : vector<1x16x8xi1>, vector<1x16x8xi32>
    %cst_3 = arith.constant dense<2147483647> : vector<1x16xi32>
    %11 = vector.multi_reduction <minsi>, %10, %cst_3 [2] : vector<1x16x8xi32> to vector<1x16xi32>
    %c0_i32 = arith.constant 0 : i32
    %12 = vector.broadcast %c0_i32 : i32 to vector<1x112xi32>
    %13 = tpu.concatenate %11, %12 in 1 : vector<1x16xi32>, vector<1x112xi32> -> vector<1x128xi32>
    %14 = tpu.iota {dimensions = array<i32: 1>} : vector<1x128xi32>
    %c1_i32 = arith.constant 1 : i32
    %15 = tpu.dynamic_rotate %13 by %c1_i32 dim 1 : vector<1x128xi32>, i32 -> vector<1x128xi32>
    %c0_i32_4 = arith.constant 0 : i32
    %16 = vector.broadcast %c0_i32_4 : i32 to vector<1x128xi32>
    %17 = arith.cmpi ne, %13, %16 : vector<1x128xi32>
    %c0_i32_5 = arith.constant 0 : i32
    %18 = vector.broadcast %c0_i32_5 : i32 to vector<1x128xi32>
    %19 = arith.cmpi eq, %14, %18 : vector<1x128xi32>
    %20 = arith.cmpi ne, %13, %15 : vector<1x128xi32>
    %21 = arith.ori %19, %20 : vector<1x128xi1>
    %22 = arith.andi %17, %21 : vector<1x128xi1>
    %23 = arith.extui %22 : vector<1x128xi1> to vector<1x128xi32>
    %24 = tpu.iota {dimensions = array<i32: 1>} : vector<1x128xi32>
    %c1_i32_6 = arith.constant 1 : i32
    %25 = vector.broadcast %c1_i32_6 : i32 to vector<1x128xi32>
    %26 = arith.cmpi sge, %24, %25 : vector<1x128xi32>
    %c1_i32_7 = arith.constant 1 : i32
    %27 = tpu.dynamic_rotate %23 by %c1_i32_7 dim 1 : vector<1x128xi32>, i32 -> vector<1x128xi32>
    %c0_i32_8 = arith.constant 0 : i32
    %28 = vector.broadcast %c0_i32_8 : i32 to vector<1x128xi32>
    %29 = arith.select %26, %27, %28 : vector<1x128xi1>, vector<1x128xi32>
    %30 = arith.addi %23, %29 : vector<1x128xi32>
    %c2_i32 = arith.constant 2 : i32
    %31 = vector.broadcast %c2_i32 : i32 to vector<1x128xi32>
    %32 = arith.cmpi sge, %24, %31 : vector<1x128xi32>
    %c2_i32_9 = arith.constant 2 : i32
    %33 = tpu.dynamic_rotate %30 by %c2_i32_9 dim 1 : vector<1x128xi32>, i32 -> vector<1x128xi32>
    %c0_i32_10 = arith.constant 0 : i32
    %34 = vector.broadcast %c0_i32_10 : i32 to vector<1x128xi32>
    %35 = arith.select %32, %33, %34 : vector<1x128xi1>, vector<1x128xi32>
    %36 = arith.addi %30, %35 : vector<1x128xi32>
    %c4_i32 = arith.constant 4 : i32
    %37 = vector.broadcast %c4_i32 : i32 to vector<1x128xi32>
    %38 = arith.cmpi sge, %24, %37 : vector<1x128xi32>
    %c4_i32_11 = arith.constant 4 : i32
    %39 = tpu.dynamic_rotate %36 by %c4_i32_11 dim 1 : vector<1x128xi32>, i32 -> vector<1x128xi32>
    %c0_i32_12 = arith.constant 0 : i32
    %40 = vector.broadcast %c0_i32_12 : i32 to vector<1x128xi32>
    %41 = arith.select %38, %39, %40 : vector<1x128xi1>, vector<1x128xi32>
    %42 = arith.addi %36, %41 : vector<1x128xi32>
    %c8_i32_13 = arith.constant 8 : i32
    %43 = vector.broadcast %c8_i32_13 : i32 to vector<1x128xi32>
    %44 = arith.cmpi sge, %24, %43 : vector<1x128xi32>
    %c8_i32_14 = arith.constant 8 : i32
    %45 = tpu.dynamic_rotate %42 by %c8_i32_14 dim 1 : vector<1x128xi32>, i32 -> vector<1x128xi32>
    %c0_i32_15 = arith.constant 0 : i32
    %46 = vector.broadcast %c0_i32_15 : i32 to vector<1x128xi32>
    %47 = arith.select %44, %45, %46 : vector<1x128xi1>, vector<1x128xi32>
    %48 = arith.addi %42, %47 : vector<1x128xi32>
    %c16_i32 = arith.constant 16 : i32
    %49 = vector.broadcast %c16_i32 : i32 to vector<1x128xi32>
    %50 = arith.cmpi sge, %24, %49 : vector<1x128xi32>
    %c16_i32_16 = arith.constant 16 : i32
    %51 = tpu.dynamic_rotate %48 by %c16_i32_16 dim 1 : vector<1x128xi32>, i32 -> vector<1x128xi32>
    %c0_i32_17 = arith.constant 0 : i32
    %52 = vector.broadcast %c0_i32_17 : i32 to vector<1x128xi32>
    %53 = arith.select %50, %51, %52 : vector<1x128xi1>, vector<1x128xi32>
    %54 = arith.addi %48, %53 : vector<1x128xi32>
    %c32_i32 = arith.constant 32 : i32
    %55 = vector.broadcast %c32_i32 : i32 to vector<1x128xi32>
    %56 = arith.cmpi sge, %24, %55 : vector<1x128xi32>
    %c32_i32_18 = arith.constant 32 : i32
    %57 = tpu.dynamic_rotate %54 by %c32_i32_18 dim 1 : vector<1x128xi32>, i32 -> vector<1x128xi32>
    %c0_i32_19 = arith.constant 0 : i32
    %58 = vector.broadcast %c0_i32_19 : i32 to vector<1x128xi32>
    %59 = arith.select %56, %57, %58 : vector<1x128xi1>, vector<1x128xi32>
    %60 = arith.addi %54, %59 : vector<1x128xi32>
    %c64_i32 = arith.constant 64 : i32
    %61 = vector.broadcast %c64_i32 : i32 to vector<1x128xi32>
    %62 = arith.cmpi sge, %24, %61 : vector<1x128xi32>
    %c64_i32_20 = arith.constant 64 : i32
    %63 = tpu.dynamic_rotate %60 by %c64_i32_20 dim 1 : vector<1x128xi32>, i32 -> vector<1x128xi32>
    %c0_i32_21 = arith.constant 0 : i32
    %64 = vector.broadcast %c0_i32_21 : i32 to vector<1x128xi32>
    %65 = arith.select %62, %63, %64 : vector<1x128xi1>, vector<1x128xi32>
    %66 = arith.addi %60, %65 : vector<1x128xi32>
    %c1_i32_22 = arith.constant 1 : i32
    %67 = vector.broadcast %c1_i32_22 : i32 to vector<1x128xi32>
    %68 = arith.subi %66, %67 : vector<1x128xi32>
    %cst_23 = arith.constant dense<0> : vector<1xi32>
    %69 = vector.multi_reduction <add>, %23, %cst_23 [1] : vector<1x128xi32> to vector<1xi32>
    %70 = vector.shape_cast %69 : vector<1xi32> to vector<1x1xi32>
    %c-1_i32 = arith.constant -1 : i32
    %71 = vector.broadcast %c-1_i32 : i32 to vector<1x128xi32>
    %72 = arith.select %22, %68, %71 : vector<1x128xi1>, vector<1x128xi32>
    %73 = arith.sitofp %13 : vector<1x128xi32> to vector<1x128xbf16>
    %74 = tpu.iota {dimensions = array<i32: 1>} : vector<1x128x128xi32>
    %cst_24 = arith.constant 0.000000e+00 : f32
    %75 = vector.broadcast %cst_24 : f32 to vector<1x8x128xf32>
    %76 = vector.shape_cast %72 : vector<1x128xi32> to vector<1x1x128xi32>
    %77 = vector.broadcast %76 : vector<1x1x128xi32> to vector<1x128x128xi32>
    %78 = arith.cmpi eq, %77, %74 : vector<1x128x128xi32>
    %79 = arith.extui %78 : vector<1x128x128xi1> to vector<1x128x128xi32>
    %80 = arith.sitofp %79 : vector<1x128x128xi32> to vector<1x128x128xf32>
    %81 = arith.truncf %80 : vector<1x128x128xf32> to vector<1x128x128xbf16>
    %82 = vector.shape_cast %73 : vector<1x128xbf16> to vector<1x1x128xbf16>
    %83 = vector.broadcast %82 : vector<1x1x128xbf16> to vector<1x8x128xbf16>
    "tpu.trace_start"() <{level = 10 : i32, message = "bqt,bjt->bqj"}> : () -> ()
    %cst_25 = arith.constant dense<0.000000e+00> : vector<1x8x128xf32>
    %84 = tpu.matmul %83, %81, %cst_25 {dimension_numbers = #tpu.dot_dimension_numbers<[2], [2], [1], [1], [0, 0, 0, 1, 1, 1], [0], [0]>} : vector<1x8x128xbf16>, vector<1x128x128xbf16>, vector<1x8x128xf32> -> vector<1x8x128xf32>
    "tpu.trace_stop"() : () -> ()
    %85 = arith.addf %75, %84 : vector<1x8x128xf32>
    %86 = vector.extract_strided_slice %85 {offsets = [0, 0, 0], sizes = [1, 1, 128], strides = [1, 1, 1]} : vector<1x8x128xf32> to vector<1x1x128xf32>
    %87 = vector.shape_cast %86 : vector<1x1x128xf32> to vector<1x128xf32>
    %cst_26 = arith.constant 5.000000e-01 : f32
    %88 = vector.broadcast %cst_26 : f32 to vector<1x128xf32>
    %89 = arith.addf %87, %88 : vector<1x128xf32>
    %90 = arith.fptosi %89 : vector<1x128xf32> to vector<1x128xi32>
    %91 = vector.broadcast %70 : vector<1x1xi32> to vector<1x128xi32>
    %92 = arith.cmpi slt, %14, %91 : vector<1x128xi32>
    %c0_i32_27 = arith.constant 0 : i32
    %93 = vector.broadcast %c0_i32_27 : i32 to vector<1x128xi32>
    %94 = arith.select %92, %90, %93 : vector<1x128xi1>, vector<1x128xi32>
    %c6_i32 = arith.constant 6 : i32
    %95 = vector.broadcast %c6_i32 : i32 to vector<1x128xi32>
    %96 = arith.cmpi sge, %94, %95 : vector<1x128xi32>
    %c3_i32 = arith.constant 3 : i32
    %97 = vector.broadcast %c3_i32 : i32 to vector<1x128xi32>
    %98 = arith.select %96, %97, %94 : vector<1x128xi1>, vector<1x128xi32>
    %c0_28 = arith.constant 0 : index
    %c0_29 = arith.constant 0 : index
    %c0_30 = arith.constant 0 : index
    %99 = vector.load %arg2[%c0_28, %c0_29, %c0_30] : memref<1x1x128xi32, #tpu.memory_space<vmem>>, vector<1x1x128xi32>
    %100 = vector.shape_cast %99 : vector<1x1x128xi32> to vector<1x128xi32>
    %101 = vector.shape_cast %98 : vector<1x128xi32> to vector<1x1x128xi32>
    tpu.vector_store %arg2[%c0_28, %c0_29, %c0_30], %101 {strides = array<i32>} : memref<1x1x128xi32, #tpu.memory_space<vmem>>, vector<1x1x128xi32>,
    %c0_31 = arith.constant 0 : index
    %c0_32 = arith.constant 0 : index
    %c0_33 = arith.constant 0 : index
    %102 = vector.load %arg3[%c0_31, %c0_32, %c0_33] : memref<1x1x1xi32, #tpu.memory_space<vmem>>, vector<1x1x1xi32>
    %103 = vector.shape_cast %102 : vector<1x1x1xi32> to vector<1x1xi32>
    %104 = vector.shape_cast %70 : vector<1x1xi32> to vector<1x1x1xi32>
    tpu.vector_store %arg3[%c0_31, %c0_32, %c0_33], %104 {strides = array<i32>} : memref<1x1x1xi32, #tpu.memory_space<vmem>>, vector<1x1x1xi32>,
    return
  }
  func.func @transform_0(%arg0: i32) -> (i32, i32, i32, i32) {
    %c0_i32 = arith.constant 0 : i32
    %c0_i32_0 = arith.constant 0 : i32
    %c0_i32_1 = arith.constant 0 : i32
    %c0_i32_2 = arith.constant 0 : i32
    return %arg0, %c0_i32, %c0_i32_0, %c0_i32_1 : i32, i32, i32, i32
  }
  func.func @transform_1(%arg0: i32) -> (i32, i32, i32) {
    %c0_i32 = arith.constant 0 : i32
    %c0_i32_0 = arith.constant 0 : i32
    %c0_i32_1 = arith.constant 0 : i32
    return %arg0, %c0_i32, %c0_i32_0 : i32, i32, i32
  }
  func.func @transform_2(%arg0: i32) -> (i32, i32, i32) {
    %c0_i32 = arith.constant 0 : i32
    %c0_i32_0 = arith.constant 0 : i32
    %c0_i32_1 = arith.constant 0 : i32
    return %arg0, %c0_i32, %c0_i32_0 : i32, i32, i32
  }
}

</mosaic_0001>

<bundles_post_ra>
// kernel: greedy_ctc_decode.1
= control target key start
LH: loop header
LB: loop body
LE: loop exit
PB: predicated region body
PF: predicated region fallthrough
CT: control target
= control target key end

     0   :  { %8 = vsyncpa [#allocation3], 0  ;;  %s903_s0 = inlined_call_operand.vmem [shape: f32[2,1,16,8], index: 0, kind: input, shape index: {}]   ;;  %s904_s1 = inlined_call_operand.hbm [shape: s32[2,1,128], index: 1, kind: output, shape index: {0}]   ;;  %s905_s2 = inlined_call_operand.vmem [shape: s32[2,1,1], index: 2, kind: output, shape index: {1}]  }
   0x1   :  { %10 = vsyncpa [#allocation3 + $0x1], 0  ;;  %s711_s9 = smov 0   ;;  %s713_s10 = smov 0  }
   0x2   :  { %s715_s11 = smov 0   ;;  %s717_s12 = smov 0  }
   0x3 LB: > { %s732_s13 = sadd.s32 4294967295, %s682_s12   ;;  %s496_s14 = sadd.s32 4294967294, %s682_s12   ;;  %s682_s12 = sphi %s717_s12, %s913_s12   ;;  %s678_s11 = sphi %s715_s11, %s912_s11   ;;  %s674_s10 = sphi %s713_s10, %s911_s10   ;;  %s670_s9 = sphi %s711_s9, %s910_s9  }
   0x4   : > { %s736_s15 = sadd.s32 1, %s682_s12   ;;  %s49_s16 = sadd.s32 1, %s678_s11 }
   0x5   : > { %s46_s17 = ssub.s32 %s682_s12, %s736_s15  ;;  %p59_p0 = scmp.ne.s32.totalorder %s678_s11, %s674_s10 }
   0x6   : > { %p47_p1 = scmp.eq.s32.totalorder %s46_s17, 0  ;;  %p60_p2 = scmp.eq.s32.totalorder %s732_s13, 1 }
   0x7   : > { %p65_p3 = scmp.ne.s32.totalorder %s674_s10, %s670_s9  ;;  %p66_p4 = scmp.eq.s32.totalorder %s496_s14, 1 }
   0x8   : > { %s747_s18 = scalar_select %p47_p1, %s678_s11, %s49_s16  }
   0x9   : > { %p749_p5 = por %p60_p2, %p59_p0  ;;  %p753_p6 = por %p66_p4, %p65_p3 }
   0xa   : > { %p499_p7 = scmp.ge.s32.totalorder %s682_s12, 1  ;;  %p118_p8 = scmp.lt.s32.totalorder %s682_s12, 3 }
   0xc   : > { %p119_p9 = pnand %p499_p7, %p118_p8 }
   0xd   : > { %p142_p10 = scmp.lt.s32.totalorder (!%p119_p9), %s732_s13, 1  ;;  %vm153_vm0 = vcmask (!%p119_p9), 64512   ;;  %v160_v4 = vlaneseq (!%p119_p9)  ;;  %vm205_vm5 = vcmask (!%p119_p9), 130112   ;;  %vm207_vm6 = vcmask (!%p119_p9), 130048   ;;  %s684_s26 = smov (!%p119_p9), 1  }
   0xe   : > { %122 = sbr.rel (%p119_p9) target bundleno = 1724 (0x6bc), region = 24  ;;  %v685_v44 = vmov (!%p119_p9), 0   ;;  %s686_s27 = smov (!%p119_p9), 2  }
   0xf   : > { %v769_v5 = vand.u32 (!%p119_p9), 127, %v160_v4  ;;  %v775_v25 = vshrl.u32 (!%p119_p9), %v160_v4, 7  ;;  %s687_s28 = smov (!%p119_p9), 4   ;;  %s688_s29 = smov (!%p119_p9), 8  }
  0x10   : > { %s689_s30 = smov (!%p119_p9), 16   ;;  %s690_s3 = smov (!%p119_p9), 32  }
  0x11   : > { %v200_v29 = vadd.s32 (!%p119_p9), 4294967288, %v769_v5  ;;  %v198_v31 = vsub.s32 (!%p119_p9), %v769_v5, %v775_v25  ;;  %vm212_vm7 = vcmp.eq.s32.totalorder (!%p119_p9), %v769_v5, 0  ;;  %vm217_vm12 = vcmp.ge.s32.totalorder (!%p119_p9), %v769_v5, 1  ;;  %s692_s4 = smov (!%p119_p9), 64   ;;  %s135_s8 = sand.u32 (!%p119_p9), 1, %s674_s10  }
  0x12   : > { %vm222_vm13 = vcmp.ge.s32.totalorder (!%p119_p9), %v769_v5, 2  ;;  %vm227_vm14 = vcmp.ge.s32.totalorder (!%p119_p9), %v769_v5, 4  ;;  %vm232_vm15 = vcmp.ge.s32.totalorder (!%p119_p9), %v769_v5, 8  ;;  %s535_s14 = sshll.u32 (!%p119_p9), %s732_s13, 4  ;;  %s136_s16 = scalar_lea.vmem (!%p119_p9), [#allocation2], %s135_s8 }
  0x13   : > { %v203_v35 = vsub.s32 (!%p119_p9), %v200_v29, %v775_v25  ;;  %s419_s17 = sshll.u32 (!%p119_p9), %s136_s16, 4  ;;  %s861_s23 = scalar_lea.hbm (!%p119_p9), %s904_s1, %s535_s14  ;;  %s863_s17 = int_to_ptr.vmem [resolvable:$true] %s419_s17 }
  0x14   : > { %s404_s24 = scalar_lea.sflag (!%p119_p9), [#allocation3], %s135_s8 }
  0x15   : > { %s761_s21 = scalar_select %p142_p10, %s732_s13, 1 }
  0x16   : > { %s620_s13 = scalar_lea.vmem %s863_s17, 16 }
  0x17   : > { %s538_s22 = sshll.u32 %s761_s21, 4  ;;  %s149_s7 = scalar_lea.vmem %s905_s2, %s761_s21 }
  0x18   : > { %s146_s25 = scalar_lea.vmem %s903_s0, %s538_s22  ;;  %p621_p11 = scmp.ne.s32.totalorder %s863_s17, %s620_s13 }
  0x19   : > { %v151_v0 = vld [vmem:[%s146_s25] sm:$0xff]  ;;  %v152_v1 = vld [vmem:[%s146_s25 + $0x8] sm:$0xff]  ;;  %s695_s25 = smov [#allocation2]  }
  0x1a   : > { %v154_v2 = vsel %vm153_vm0, %v151_v0, -inf  ;;  %v157_v3 = vsel %vm153_vm0, %v152_v1, -inf  ;;  %p622_p12 = pnand %p621_p11, %p749_p5 }
  0x1b   : > { %155 = vmax.xlane.f32.xlu0 %v154_v2 }
  0x1c   : > { %p623_p13 = pneg %p622_p12 }
  0x1f   : > { %158 = vmax.xlane.f32.xlu0 %v157_v3 }
  0xa8   : > { %v156_v6 = vpop.xlane.xlu0 %155 }
  0xa9   : > { %vm162_vm1 = vcmp.eq.f32.partialorder %v151_v0, %v156_v6  ;;  %v691_v0 = vmov 0.0  }
  0xaa   : > { %v164_v7 = vsel %vm162_vm1, %v769_v5, 8  ;;  %vm253_vm1 = vcmask 1040384   ;;  %548 = vmatprep.subr.bf16.mxu0 %v691_v0 }
  0xab   : > { %v166_v8 = vsel %vm153_vm0, %v164_v7, 2147483647 }
  0xac   : > { %v159_v9 = vpop.xlane.xlu0 %158  ;;  %v168_v10 = vshra.s32 %v166_v8, 16  ;;  %v167_v16 = vand.u32 65535, %v166_v8 }
  0xad   : > { %vm163_vm2 = vcmp.eq.f32.partialorder %v152_v1, %v159_v9 }
  0xae   : > { %v165_v11 = vsel %vm163_vm2, %v769_v5, 8  ;;  %v170_v12 = vcvt.s32.f32 %v168_v10  ;;  %v169_v18 = vcvt.s32.f32 %v167_v16  ;;  %vm242_vm2 = vcmp.ge.s32.totalorder %v769_v5, 32 }
  0xaf   : > { %v181_v13 = vsel %vm153_vm0, %v165_v11, 2147483647  ;;  %vm237_vm0 = vcmp.ge.s32.totalorder %v769_v5, 16  ;;  %v289_v11 = vsub.s32 0, %v775_v25  ;;  %v273_v16 = vadd.s32 16, %v775_v25 }
  0xb0   : > { %171 = vmin.xlane.f32.xlu1 %v170_v12  ;;  %v183_v14 = vshra.s32 %v181_v13, 16  ;;  %v182_v19 = vand.u32 65535, %v181_v13 }
  0xb2   : > { %v185_v15 = vcvt.s32.f32 %v183_v14  ;;  %v184_v22 = vcvt.s32.f32 %v182_v19  ;;  %v276_v19 = vadd.s32 40, %v775_v25 }
  0xb4   : > { %186 = vmin.xlane.f32.xlu1 %v185_v15 }
 0x13d   : > { %v172_v17 = vpop.xlane.xlu1 %171 }
 0x13e   : > { %vm173_vm3 = vcmp.eq.f32.partialorder %v170_v12, %v172_v17  ;;  %v178_v24 = vcvt.f32.s32 %v172_v17  ;;  %v272_v12 = vadd.s32 8, %v775_v25  ;;  %v274_v17 = vadd.s32 24, %v775_v25 }
 0x13f   : > { %v174_v20 = vsel %vm173_vm3, %v169_v18, inf  ;;  %vm693_vm3 = vmmov 0   ;;  %v275_v18 = vadd.s32 32, %v775_v25 }
 0x140   : > { %175 = vmin.xlane.f32.xlu0 %v174_v20  ;;  %v179_v30 = vshll.u32 %v178_v24, 16  ;;  %564 = vmatprep.mubr.msk.bf16.mxu0 %vm693_vm3, %v691_v0  ;;  %v277_v20 = vadd.s32 48, %v775_v25  ;;  %v281_v24 = vadd.s32 80, %v775_v25 }
 0x141   : > { %v187_v21 = vpop.xlane.xlu1 %186 }
 0x142   : > { %vm188_vm4 = vcmp.eq.f32.partialorder %v185_v15, %v187_v21  ;;  %v193_v27 = vcvt.f32.s32 %v187_v21  ;;  %v694_v15 = vmov 1.0|1.0   ;;  %v278_v21 = vadd.s32 56, %v775_v25 }
 0x143   : > { %v189_v23 = vsel %vm188_vm4, %v184_v22, inf  ;;  %vm247_vm4 = vcmp.ge.s32.totalorder %v769_v5, 64  ;;  %v279_v22 = vadd.s32 64, %v775_v25 }
 0x144   : > { %190 = vmin.xlane.f32.xlu1 %v189_v23  ;;  %v194_v33 = vshll.u32 %v193_v27, 16  ;;  %v280_v23 = vadd.s32 72, %v775_v25  ;;  %v283_v27 = vadd.s32 96, %v775_v25 }
 0x1cd   : > { %v176_v26 = vpop.xlane.xlu0 %175 }
 0x1ce   : > { %v177_v28 = vcvt.f32.s32 %v176_v26  ;;  %v282_v26 = vadd.s32 88, %v775_v25 }
 0x1d0   : > { %v180_v34 = vadd.s32 %v179_v30, %v177_v28  ;;  %v284_v28 = vadd.s32 104, %v775_v25  ;;  %v285_v30 = vadd.s32 112, %v775_v25 }
 0x1d1   : > { %v191_v32 = vpop.xlane.xlu1 %190 }
 0x1d2   : > { %v192_v36 = vcvt.f32.s32 %v191_v32  ;;  %v199_v38 = vrot.slane %v180_v34, %v198_v31  ;;  %v286_v31 = vadd.s32 120, %v775_v25 }
 0x1d4   : > { %v195_v37 = vadd.s32 %v194_v33, %v192_v36 }
 0x1d6   : > { %v204_v39 = vrot.slane %v195_v37, %v203_v35 }
 0x1d8   : > { %v206_v40 = vsel %vm205_vm5, %v204_v39, %v199_v38 }
 0x1d9   : > { %v781_v41 = vsel %vm207_vm6, %v206_v40, 0 }
 0x1da   : > { %209 = vrot.lane.b32.xlu0 %v781_v41, %s684_s26  ;;  %vm211_vm9 = vcmp.ne.s32.totalorder %v781_v41, 0  ;;  %v268_v33 = vcvt.s32.f32 %v781_v41 }
 0x1dc   : > { %v269_v37 = vpack.c.bf16 %v268_v33, %v268_v33 }
 0x1de   : > { %v348_v39 = vpack.i.b16 %v269_v37, %v269_v37 }
 0x1e0   : > { %v353_v40 = vrot.slane %v348_v39, %v289_v11 }
 0x24c   : > { %v210_v42 = vpop.permute.xlu0 %209 }
 0x24d   : > { %vm213_vm8 = vcmp.ne.s32.totalorder %v781_v41, %v210_v42 }
 0x24e   : > { %vm214_vm10 = vmor %vm212_vm7, %vm213_vm8 }
 0x24f   : > { %vm787_vm11 = vmand %vm211_vm9, %vm214_vm10 }
 0x250   : > { %v216_v45 = vsel %vm787_vm11, 1, %v685_v44 }
 0x251   : > { %218 = vrot.lane.b32.xlu1 %v216_v45, %s684_s26  ;;  %v254_v61 = vsel %vm253_vm1, %v216_v45, 0  ;;  %s624_s26 = sshll.u32 %s695_s25, 4  ;;  %s625_s26 = int_to_ptr.vmem [resolvable:$false] %s624_s26 }
 0x252   : > { %v256_v62 = vshrl.u32 %v254_v61, 16  ;;  %v255_v4 = vand.u32 65535, %v254_v61  ;;  %p627_p0 = scmp.lt.s32.totalorder %s863_s17, %s625_s26 }
 0x254   : > { %v258_v63 = vcvt.s32.f32 %v256_v62  ;;  %v257_v6 = vcvt.s32.f32 %v255_v4 }
 0x2c3   : > { %v219_v46 = vpop.permute.xlu1 %218 }
 0x2c4   : > { %v220_v47 = vsel %vm217_vm12, %v219_v46, 0 }
 0x2c5   : > { %v221_v48 = vadd.s32 %v220_v47, %v216_v45 }
 0x2c7   : > { %223 = vrot.lane.b32.xlu1 %v221_v48, %s686_s27  ;;  %s626_s27 = scalar_lea.vmem %s625_s26, 32 }
 0x2c8   : > { %p628_p1 = scmp.lt.s32.totalorder %s626_s27, %s620_s13 }
 0x2ca   : > { %p629_p2 = por %p628_p1, %p627_p0 }
 0x2cc   : > { %p630_p3 = pnand %p629_p2, %p623_p13 }
 0x339   : > { %v224_v49 = vpop.permute.xlu1 %223 }
 0x33a   : > { %v225_v50 = vsel %vm222_vm13, %v224_v49, 0 }
 0x33b   : > { %v226_v51 = vadd.s32 %v225_v50, %v221_v48 }
 0x33d   : > { %228 = vrot.lane.b32.xlu1 %v226_v51, %s687_s28 }
 0x3af   : > { %v229_v52 = vpop.permute.xlu1 %228 }
 0x3b0   : > { %v230_v53 = vsel %vm227_vm14, %v229_v52, 0 }
 0x3b1   : > { %v231_v54 = vadd.s32 %v230_v53, %v226_v51 }
 0x3b3   : > { %233 = vrot.lane.b32.xlu0 %v231_v54, %s688_s29 }
 0x425   : > { %v234_v55 = vpop.permute.xlu0 %233 }
 0x426   : > { %v235_v56 = vsel %vm232_vm15, %v234_v55, 0 }
 0x427   : > { %v236_v57 = vadd.s32 %v235_v56, %v231_v54 }
 0x429   : > { %238 = vrot.lane.b32.xlu1 %v236_v57, %s689_s30 }
 0x49b   : > { %v239_v58 = vpop.permute.xlu1 %238 }
 0x49c   : > { %v240_v59 = vsel %vm237_vm0, %v239_v58, 0 }
 0x49d   : > { %v241_v60 = vadd.s32 %v240_v59, %v236_v57 }
 0x49f   : > { %243 = vrot.lane.b32.xlu0 %v241_v60, %s690_s3 }
 0x4be   : > { %261 = vadd.xlane.f32.xlu0 %v258_v63 }
 0x511   : > { %v244_v1 = vpop.permute.xlu0 %243 }
 0x512   : > { %v245_v2 = vsel %vm242_vm2, %v244_v1, 0 }
 0x513   : > { %v246_v3 = vadd.s32 %v245_v2, %v241_v60 }
 0x515   : > { %248 = vrot.lane.b32.xlu1 %v246_v3, %s692_s4 }
 0x539   : > { %259 = vadd.xlane.f32.xlu1 %v257_v6 }
 0x54b   : > { %v262_v29 = vpop.xlane.xlu0 %261 }
 0x54c   : > { %v264_v32 = vcvt.f32.s32 %v262_v29 }
 0x54e   : > { %v265_v35 = vshll.u32 %v264_v32, 16 }
 0x587   : > { %v249_v7 = vpop.permute.xlu1 %248 }
 0x588   : > { %v250_v8 = vsel %vm247_vm4, %v249_v7, 0 }
 0x589   : > { %v251_v9 = vadd.s32 %v250_v8, %v246_v3 }
 0x58b   : > { %v502_v10 = vadd.s32 4294967295, %v251_v9 }
 0x58d   : > { %v267_v13 = vsel %vm787_vm11, %v502_v10, 4294967295 }
 0x58e   : > { %v808_v14 = vrot.slane %v267_v13, %v289_v11 }
 0x590   : > { %vm291_vm5 = vcmp.eq.s32.totalorder %v808_v14, %v775_v25  ;;  %vm292_vm6 = vcmp.eq.s32.totalorder %v808_v14, %v272_v12  ;;  %vm293_vm8 = vcmp.eq.s32.totalorder %v808_v14, %v273_v16  ;;  %vm294_vm9 = vcmp.eq.s32.totalorder %v808_v14, %v274_v17 }
 0x591   : > { %vm519_vm7 = vmpackc.low %vm292_vm6, %vm291_vm5  ;;  %vm295_vm11 = vcmp.eq.s32.totalorder %v808_v14, %v275_v18  ;;  %vm296_vm12 = vcmp.eq.s32.totalorder %v808_v14, %v276_v19  ;;  %vm297_vm14 = vcmp.eq.s32.totalorder %v808_v14, %v277_v20  ;;  %vm298_vm15 = vcmp.eq.s32.totalorder %v808_v14, %v278_v21 }
 0x592   : > { %549 = vmatpush3.bf16.xpose.msk.msra.mxu0 %vm519_vm7, %v694_v15  ;;  %vm521_vm10 = vmpackc.low %vm294_vm9, %vm293_vm8  ;;  %vm299_vm1 = vcmp.eq.s32.totalorder %v808_v14, %v279_v22  ;;  %vm300_vm2 = vcmp.eq.s32.totalorder %v808_v14, %v280_v23  ;;  %vm301_vm4 = vcmp.eq.s32.totalorder %v808_v14, %v281_v24  ;;  %vm302_vm5 = vcmp.eq.s32.totalorder %v808_v14, %v282_v26 }
 0x593   : > { %550 = vmatprep.subr.bf16.mxu0 %v691_v0  ;;  %vm523_vm13 = vmpackc.low %vm296_vm12, %vm295_vm11  ;;  %vm303_vm7 = vcmp.eq.s32.totalorder %v808_v14, %v283_v27  ;;  %vm304_vm8 = vcmp.eq.s32.totalorder %v808_v14, %v284_v28  ;;  %vm306_vm11 = vcmp.eq.s32.totalorder %v808_v14, %v286_v31  ;;  %vm401_vm12 = vcmask 0  }
 0x594   : > { %vm525_vm0 = vmpackc.low %vm298_vm15, %vm297_vm14 }
 0x595   : > { %vm527_vm3 = vmpackc.low %vm300_vm2, %vm299_vm1 }
 0x596   : > { %vm529_vm6 = vmpackc.low %vm302_vm5, %vm301_vm4 }
 0x597   : > { %vm531_vm9 = vmpackc.low %vm304_vm8, %vm303_vm7 }
 0x59a   : > { %551 = vmatpush3.bf16.xpose.msk.msra.mxu0 %vm521_vm10, %v694_v15  ;;  %vm305_vm10 = vcmp.eq.s32.totalorder %v808_v14, %v285_v30 }
 0x59b   : > { %552 = vmatprep.subr.bf16.mxu0 %v691_v0 }
 0x5a2   : > { %553 = vmatpush3.bf16.xpose.msk.msra.mxu0 %vm523_vm13, %v694_v15  ;;  %vm533_vm13 = vmpackc.low %vm306_vm11, %vm305_vm10 }
 0x5a3   : > { %554 = vmatprep.subr.bf16.mxu0 %v691_v0 }
 0x5aa   : > { %555 = vmatpush3.bf16.xpose.msk.msra.mxu0 %vm525_vm0, %v694_v15 }
 0x5ab   : > { %556 = vmatprep.subr.bf16.mxu0 %v691_v0 }
 0x5b2   : > { %557 = vmatpush3.bf16.xpose.msk.msra.mxu0 %vm527_vm3, %v694_v15 }
 0x5b3   : > { %558 = vmatprep.subr.bf16.mxu0 %v691_v0 }
 0x5ba   : > { %559 = vmatpush3.bf16.xpose.msk.msra.mxu0 %vm529_vm6, %v694_v15 }
 0x5bb   : > { %560 = vmatprep.subr.bf16.mxu0 %v691_v0 }
 0x5c2   : > { %561 = vmatpush3.bf16.xpose.msk.msra.mxu0 %vm531_vm9, %v694_v15 }
 0x5c3   : > { %562 = vmatprep.subr.bf16.mxu0 %v691_v0 }
 0x5c6   : > { %v260_v34 = vpop.xlane.xlu1 %259 }
 0x5c7   : > { %v263_v36 = vcvt.f32.s32 %v260_v34 }
 0x5c9   : > { %v266_v38 = vadd.s32 %v265_v35, %v263_v36 }
 0x5ca   : > { %563 = vmatpush3.bf16.xpose.msk.msra.mxu0 %vm533_vm13, %v694_v15 }
 0x5cb   : > { %402 = vst.msk [vmem:[%s149_s7] sm:$0x1] %vm401_vm12, %v266_v38  ;;  %vm396_vm14 = vcmp.lt.s32.totalorder %v769_v5, %v266_v38 }
 0x5d1   : > { %565 = vmatmul.mubr.bf16.vlgmr.msra.gmra.mrb[0].mxu0 %v353_v40 }
 0x6a4   : > { %v388_v41 = vpop.f32.mrb[0].mxu0 }
 0x6a5   : > { %v394_v42 = vadd.f32 0.5, %v388_v41  ;;  %v566_v43 = vpop.f32.mrb[1].mxu0 }
 0x6a6   : > { %v391_v44 = vpop.f32.mrb[2].mxu0 }
 0x6a7   : > { %v568_v45 = vtrunc.f32 %v394_v42  ;;  %v567_v46 = vpop.f32.mrb[3].mxu0 }
 0x6a9   : > { %v569_v47 = vcvt.f32.s32 %v568_v45 }
 0x6ab   : > { %v397_v48 = vsel %vm396_vm14, %v569_v47, 0 }
 0x6ac   : > { %vm398_vm15 = vcmp.ge.s32.totalorder %v397_v48, 6 }
 0x6ad   : > { %v399_v25 = vsel %vm398_vm15, 3, %v397_v48 }
 0x6ae   : > { %400 = vst [vmem:[%s136_s16] sm:$0x1] %v399_v25 }
 0x6af   : > { %633 = shalt.err (!%p630_p3)
}
 0x6b0   : > { %s634_s28 = scalar_lea.hbm %s861_s23, 16  ;;  %s638_s3 = scalar_lea.hbm %s904_s1, 32 }
 0x6b1   : > { %p635_p4 = scmp.ne.s32.totalorder %s861_s23, %s634_s28  ;;  %p639_p9 = scmp.lt.u32.totalorder %s861_s23, %s904_s1 }
 0x6b2   : > { %p640_p10 = scmp.lt.u32.totalorder %s638_s3, %s634_s28  ;;  %p642_p12 = scmp.lt.u32.totalorder %s634_s28, %s861_s23 }
 0x6b3   : > { %p636_p7 = pnand %p635_p4, %p749_p5 }
 0x6b4   : > { %p641_p11 = por %p640_p10, %p639_p9 }
 0x6b5   : > { %p637_p8 = pneg %p636_p7 }
 0x6b6   : > { %p643_p13 = por %p642_p12, %p641_p11 }
 0x6b8   : > { %p644_p0 = pnand %p643_p13, %p637_p8 }
 0x6ba   : > { %647 = shalt.err (!%p644_p0)
}
 0x6bb   : > { %570 = dma.vmem_to_hbm [thread:$0]  (%p749_p5), %s863_s17, 16, %s861_s23, %s404_s24  }
 0x6bc PF: > { %p576_p1 = scmp.ge.s32.totalorder %s682_s12, 2  ;;  %s434_s6 = sand.u32 1, %s670_s9  }
 0x6bd   : > { %s435_s7 = scalar_lea.sflag [#allocation3], %s434_s6 }
 0x6be   : > { %p573_p2 = pnand %p576_p1, %p753_p6 }
 0x6c0   : > { %665 = dma.done.wait (!%p573_p2), %s435_s7, 16  }
 0x6c1   : > { %667 = vsyncadd (!%p573_p2), %s435_s7, 4294967280  ;;  %p13_p3 = scmp.ge.s32.totalorder %s736_s15, 4   ;;  %s910_s9 = smov %s674_s10 }
 0x6c2   : > { %s911_s10 = smov %s678_s11  ;;  %s912_s11 = smov %s747_s18 }
 0x6c3   : > { %s913_s12 = smov %s736_s15  ;;  %15 = sbr.rel (!%p13_p3) target bundleno = 3 (0x3), region = 71 }
 0x6ca   :  { %445 = vsyncpa [#allocation3], 1 }
 0x6cb   :  { %447 = vsyncpa [#allocation3 + $0x1], 1 }

</bundles_post_ra>
